<compile_context>
chip_gen: v7x
topology: tpu7x:2x2x1
jax: 0.10.0
libtpu: 0.0.40
codegen_flags: <defaults>
</compile_context>

<pallas_src>
import functools

import jax
import jax.numpy as jnp
from jax.experimental import pallas as pl
from jax.experimental.pallas import tpu as pltpu


def _channel_attention_kernel(x_ref, w1t_ref, b1_ref, w2_ref, b2_ref, out_ref,
                              *, inv_hw):
    # x_ref/out_ref: (Bt, C, HWp)
    # w1t_ref: (C, Cr)  (= fc1.weight.T)      b1_ref: (1, Cr)
    # w2_ref:  (C, Cr)  (= fc2.weight)        b2_ref: (C, 1)
    x = x_ref[...]                                                   # (Bt, C, HWp)

    # Global average pool.  Zero-padded lanes contribute 0 to the sum; divide by
    # the true (unpadded) H*W.  Accumulate in f32 (bf16-safe).
    pooled = jnp.sum(x, axis=-1, keepdims=True,
                     dtype=jnp.float32) * inv_hw                     # (Bt, C, 1)

    # Tiny 2-layer MLP on the VPU/XLU: broadcast-multiply + reduce.  Keeping the
    # channel axis on sublanes the whole way avoids MXU layout changes and lets
    # the final (Bt, C, 1) scale broadcast directly over the HWp lanes.
    w1t = w1t_ref[...].astype(jnp.float32)                           # (C, Cr)
    w2 = w2_ref[...].astype(jnp.float32)                             # (C, Cr)
    b1 = b1_ref[...].astype(jnp.float32)                             # (1, Cr)
    b2 = b2_ref[...].astype(jnp.float32)                             # (C, 1)

    h = jnp.sum(pooled * w1t, axis=1, keepdims=True) + b1            # (Bt, 1, Cr)
    h = jnp.maximum(h, 0.0)                                          # ReLU
    s = jnp.sum(h * w2, axis=-1, keepdims=True) + b2                 # (Bt, C, 1)
    scale = jax.nn.sigmoid(s)                                        # (Bt, C, 1)

    out_ref[...] = (scale * x).astype(out_ref.dtype)                 # broadcast over HWp


def _pick_batch_tile(batch, slab_bytes, vmem_budget_bytes):
    """Smallest divisor of `batch` whose per-step block moves >= ~1 MiB, while the
    double-buffered in+out footprint (4x slab) stays inside the VMEM budget."""
    target_step_bytes = 1 << 20
    bt = 1
    for cand in range(1, batch + 1):
        if batch % cand:
            continue
        if 4 * cand * slab_bytes > vmem_budget_bytes:
            break
        bt = cand
        if cand * slab_bytes >= target_step_bytes:
            break
    return bt


@jax.jit
def channel_attention(x_nchw, w1, b1, w2, b2):
    """x_nchw: (B, C, H, W). w1: (Cr, C), b1: (Cr,), w2: (C, Cr), b2: (C,)."""
    B, C, H, W = x_nchw.shape
    Cr = w1.shape[0]
    HW = H * W
    # Lane-dense spatial axis: pad flattened H*W up to a multiple of 128.
    HWp = max(128, ((HW + 127) // 128) * 128)

    x_flat = x_nchw.reshape(B, C, HW)
    if HWp != HW:
        x_flat = jnp.pad(x_flat, ((0, 0), (0, 0), (0, HWp - HW)))

    itemsize = x_flat.dtype.itemsize
    slab_bytes = C * HWp * itemsize
    # Conservative cross-chip VMEM budget (v7x: 64 MiB physical).
    vmem_budget = 32 * (1 << 20)
    Bt = _pick_batch_tile(B, slab_bytes, vmem_budget)
    # TODO(synk): if even a single (C, H*W) slab exceeds the VMEM budget
    # (4*slab_bytes > budget), tile the HW axis with a two-phase pool+rescale
    # pipeline instead of taking the whole slab.

    w1t = w1.T                      # (C, Cr) — same orientation as w2
    b1_row = b1.reshape(1, Cr)
    b2_col = b2.reshape(C, 1)

    kernel = functools.partial(_channel_attention_kernel, inv_hw=1.0 / HW)

    cost = pl.CostEstimate(
        flops=2 * B * C * HWp + 4 * B * C * Cr,
        transcendentals=B * C,
        bytes_accessed=2 * B * C * HWp * itemsize + (2 * C * Cr + Cr + C) * 4,
    )

    out_flat = pl.pallas_call(
        kernel,
        out_shape=jax.ShapeDtypeStruct((B, C, HWp), x_flat.dtype),
        grid_spec=pltpu.PrefetchScalarGridSpec(
            num_scalar_prefetch=0,
            grid=(B // Bt,),
            in_specs=[
                pl.BlockSpec((Bt, C, HWp), lambda b: (b, 0, 0)),   # x batch tile
                pl.BlockSpec((C, Cr), lambda b: (0, 0)),           # w1.T
                pl.BlockSpec((1, Cr), lambda b: (0, 0)),           # b1
                pl.BlockSpec((C, Cr), lambda b: (0, 0)),           # w2
                pl.BlockSpec((C, 1), lambda b: (0, 0)),            # b2
            ],
            out_specs=pl.BlockSpec((Bt, C, HWp), lambda b: (b, 0, 0)),
        ),
        compiler_params=pltpu.CompilerParams(
            dimension_semantics=("parallel",),
            vmem_limit_bytes=40 * (1 << 20)),
        input_output_aliases={0: 0},
        cost_estimate=cost,
    )(x_flat, w1t, b1_row, w2, b2_col)

    out = out_flat[:, :, :HW] if HWp != HW else out_flat
    return out.reshape(B, C, H, W)


def channel_attention_ref(x, w1, b1, w2, b2):
    # Pure-JAX reference matching the PyTorch forward exactly (f32 matmuls).
    pooled = jnp.mean(x, axis=(2, 3))                                      # (B, C)
    h = jnp.maximum(
        jnp.dot(pooled, w1.T, precision=jax.lax.Precision.HIGHEST) + b1, 0.0)
    s = jax.nn.sigmoid(
        jnp.dot(h, w2.T, precision=jax.lax.Precision.HIGHEST) + b2)
    return s[:, :, None, None] * x


if __name__ == "__main__":
    # Small shapes consistent with the module: reduction_ratio=16 -> C >= 16.
    B, C, H, W = 2, 32, 16, 16
    reduction_ratio = 16
    Cr = C // reduction_ratio

    key = jax.random.PRNGKey(0)
    kx, kw1, kb1, kw2, kb2 = jax.random.split(key, 5)

    x = jax.random.normal(kx, (B, C, H, W), dtype=jnp.float32)

    # Deterministic init mimicking nn.Linear (uniform +/- 1/sqrt(fan_in)).
    bound1 = 1.0 / (C ** 0.5)
    w1 = jax.random.uniform(kw1, (Cr, C), jnp.float32, -bound1, bound1)
    b1 = jax.random.uniform(kb1, (Cr,), jnp.float32, -bound1, bound1)
    bound2 = 1.0 / (Cr ** 0.5)
    w2 = jax.random.uniform(kw2, (C, Cr), jnp.float32, -bound2, bound2)
    b2 = jax.random.uniform(kb2, (C,), jnp.float32, -bound2, bound2)

    out = jax.block_until_ready(channel_attention(x, w1, b1, w2, b2))
    ref = channel_attention_ref(x, w1, b1, w2, b2)
    assert out.shape == (B, C, H, W)
    assert jnp.allclose(out, ref, atol=1e-5, rtol=1e-5), "mismatch vs reference"

    # Non-multiple-of-128 spatial size exercises the lane-padding path.
    H2 = W2 = 14
    x2 = jax.random.normal(kx, (B, C, H2, W2), dtype=jnp.float32)
    out2 = jax.block_until_ready(channel_attention(x2, w1, b1, w2, b2))
    ref2 = channel_attention_ref(x2, w1, b1, w2, b2)
    assert out2.shape == (B, C, H2, W2)
    assert jnp.allclose(out2, ref2, atol=1e-5, rtol=1e-5), "mismatch (padded HW)"

    print("KERNEL_OK")
</pallas_src>

<mosaic_0001>
module attributes {stable_mosaic.version = 11 : i64} {
  func.func @_channel_attention_kernel(%arg0: i32, %arg1: memref<2x32x256xf32, #tpu.memory_space<vmem>>, %arg2: memref<32x2xf32, #tpu.memory_space<vmem>>, %arg3: memref<1x2xf32, #tpu.memory_space<vmem>>, %arg4: memref<32x2xf32, #tpu.memory_space<vmem>>, %arg5: memref<32x1xf32, #tpu.memory_space<vmem>>, %arg6: memref<2x32x256xf32, #tpu.memory_space<vmem>>) attributes {dimension_semantics = [#tpu.dimension_semantics<parallel>], iteration_bounds = array<i64: 1>, scalar_prefetch = 0 : i64, scratch_operands = 0 : i64, tpu.core_type = #tpu.core_type<tc>, window_params = [{transform_indices = @transform_0, window_bounds = array<i64: 2, 32, 256>}, {pipeline_mode = #tpu.pipeline_mode<synchronous>, transform_indices = @transform_1, window_bounds = array<i64: 32, 2>}, {pipeline_mode = #tpu.pipeline_mode<synchronous>, transform_indices = @transform_2, window_bounds = array<i64: 1, 2>}, {pipeline_mode = #tpu.pipeline_mode<synchronous>, transform_indices = @transform_3, window_bounds = array<i64: 32, 2>}, {pipeline_mode = #tpu.pipeline_mode<synchronous>, transform_indices = @transform_4, window_bounds = array<i64: 32, 1>}, {transform_indices = @transform_5, window_bounds = array<i64: 2, 32, 256>}]} {
    %c0 = arith.constant 0 : index
    %c0_0 = arith.constant 0 : index
    %c0_1 = arith.constant 0 : index
    %0 = vector.load %arg1[%c0, %c0_0, %c0_1] : memref<2x32x256xf32, #tpu.memory_space<vmem>>, vector<2x32x256xf32>
    %cst = arith.constant dense<0.000000e+00> : vector<2x32xf32>
    %1 = vector.multi_reduction <add>, %0, %cst [2] : vector<2x32x256xf32> to vector<2x32xf32>
    %2 = vector.shape_cast %1 : vector<2x32xf32> to vector<2x32x1xf32>
    %cst_2 = arith.constant 3.906250e-03 : f32
    %3 = vector.broadcast %cst_2 : f32 to vector<2x32x1xf32>
    %4 = arith.mulf %2, %3 : vector<2x32x1xf32>
    %c0_3 = arith.constant 0 : index
    %c0_4 = arith.constant 0 : index
    %5 = vector.load %arg2[%c0_3, %c0_4] : memref<32x2xf32, #tpu.memory_space<vmem>>, vector<32x2xf32>
    %c0_5 = arith.constant 0 : index
    %c0_6 = arith.constant 0 : index
    %6 = vector.load %arg4[%c0_5, %c0_6] : memref<32x2xf32, #tpu.memory_space<vmem>>, vector<32x2xf32>
    %c0_7 = arith.constant 0 : index
    %c0_8 = arith.constant 0 : index
    %7 = vector.load %arg3[%c0_7, %c0_8] : memref<1x2xf32, #tpu.memory_space<vmem>>, vector<1x2xf32>
    %c0_9 = arith.constant 0 : index
    %c0_10 = arith.constant 0 : index
    %8 = vector.load %arg5[%c0_9, %c0_10] : memref<32x1xf32, #tpu.memory_space<vmem>>, vector<32x1xf32>
    %9 = vector.shape_cast %5 : vector<32x2xf32> to vector<1x32x2xf32>
    %10 = vector.broadcast %4 : vector<2x32x1xf32> to vector<2x32x2xf32>
    %11 = vector.broadcast %9 : vector<1x32x2xf32> to vector<2x32x2xf32>
    %12 = arith.mulf %10, %11 : vector<2x32x2xf32>
    %cst_11 = arith.constant dense<0.000000e+00> : vector<2x2xf32>
    %13 = vector.multi_reduction <add>, %12, %cst_11 [1] : vector<2x32x2xf32> to vector<2x2xf32>
    %14 = vector.shape_cast %13 : vector<2x2xf32> to vector<2x1x2xf32>
    %15 = vector.shape_cast %7 : vector<1x2xf32> to vector<1x1x2xf32>
    %16 = vector.broadcast %15 : vector<1x1x2xf32> to vector<2x1x2xf32>
    %17 = arith.addf %14, %16 : vector<2x1x2xf32>
    %cst_12 = arith.constant 0.000000e+00 : f32
    %18 = vector.broadcast %cst_12 : f32 to vector<2x1x2xf32>
    %19 = arith.maximumf %17, %18 : vector<2x1x2xf32>
    %20 = vector.shape_cast %6 : vector<32x2xf32> to vector<1x32x2xf32>
    %21 = vector.broadcast %19 : vector<2x1x2xf32> to vector<2x32x2xf32>
    %22 = vector.broadcast %20 : vector<1x32x2xf32> to vector<2x32x2xf32>
    %23 = arith.mulf %21, %22 : vector<2x32x2xf32>
    %cst_13 = arith.constant dense<0.000000e+00> : vector<2x32xf32>
    %24 = vector.multi_reduction <add>, %23, %cst_13 [2] : vector<2x32x2xf32> to vector<2x32xf32>
    %25 = vector.shape_cast %24 : vector<2x32xf32> to vector<2x32x1xf32>
    %26 = vector.shape_cast %8 : vector<32x1xf32> to vector<1x32x1xf32>
    %27 = vector.broadcast %26 : vector<1x32x1xf32> to vector<2x32x1xf32>
    %28 = arith.addf %25, %27 : vector<2x32x1xf32>
    %29 = arith.negf %28 : vector<2x32x1xf32>
    %30 = math.exp %29 : vector<2x32x1xf32>
    %cst_14 = arith.constant 1.000000e+00 : f32
    %31 = vector.broadcast %cst_14 : f32 to vector<2x32x1xf32>
    %32 = arith.addf %31, %30 : vector<2x32x1xf32>
    %33 = arith.divf %31, %32 : vector<2x32x1xf32>
    %34 = vector.broadcast %33 : vector<2x32x1xf32> to vector<2x32x256xf32>
    %35 = arith.mulf %34, %0 : vector<2x32x256xf32>
    %c0_15 = arith.constant 0 : index
    %c0_16 = arith.constant 0 : index
    %c0_17 = arith.constant 0 : index
    %36 = vector.load %arg6[%c0_15, %c0_16, %c0_17] : memref<2x32x256xf32, #tpu.memory_space<vmem>>, vector<2x32x256xf32>
    tpu.vector_store %arg6[%c0_15, %c0_16, %c0_17], %35 {strides = array<i32>} : memref<2x32x256xf32, #tpu.memory_space<vmem>>, vector<2x32x256xf32>,
    return
  }
  func.func @transform_0(%arg0: i32) -> (i32, i32, i32) {
    %c0_i32 = arith.constant 0 : i32
    %c0_i32_0 = arith.constant 0 : i32
    %c0_i32_1 = arith.constant 0 : i32
    return %arg0, %c0_i32, %c0_i32_0 : i32, i32, i32
  }
  func.func @transform_1(%arg0: i32) -> (i32, i32) {
    %c0_i32 = arith.constant 0 : i32
    %c0_i32_0 = arith.constant 0 : i32
    %c0_i32_1 = arith.constant 0 : i32
    return %c0_i32, %c0_i32_0 : i32, i32
  }
  func.func @transform_2(%arg0: i32) -> (i32, i32) {
    %c0_i32 = arith.constant 0 : i32
    %c0_i32_0 = arith.constant 0 : i32
    %c0_i32_1 = arith.constant 0 : i32
    return %c0_i32, %c0_i32_0 : i32, i32
  }
  func.func @transform_3(%arg0: i32) -> (i32, i32) {
    %c0_i32 = arith.constant 0 : i32
    %c0_i32_0 = arith.constant 0 : i32
    %c0_i32_1 = arith.constant 0 : i32
    return %c0_i32, %c0_i32_0 : i32, i32
  }
  func.func @transform_4(%arg0: i32) -> (i32, i32) {
    %c0_i32 = arith.constant 0 : i32
    %c0_i32_0 = arith.constant 0 : i32
    %c0_i32_1 = arith.constant 0 : i32
    return %c0_i32, %c0_i32_0 : i32, i32
  }
  func.func @transform_5(%arg0: i32) -> (i32, i32, i32) {
    %c0_i32 = arith.constant 0 : i32
    %c0_i32_0 = arith.constant 0 : i32
    %c0_i32_1 = arith.constant 0 : i32
    return %arg0, %c0_i32, %c0_i32_0 : i32, i32, i32
  }
}

</mosaic_0001>

<bundles_post_ra>
// kernel: channel_attention.1
= control target key start
LH: loop header
LB: loop body
LE: loop exit
PB: predicated region body
PF: predicated region fallthrough
CT: control target
= control target key end

     0   :  { %vm89_vm0 = vcmask 15360   ;;  %s581_s0 = inlined_call_operand.vmem [shape: f32[2,32,256], index: 0, kind: input, shape index: {}, may-alias: {0,5}]   ;;  %s582_s1 = inlined_call_operand.vmem [shape: f32[32,2], index: 1, kind: input, shape index: {}]   ;;  %s583_s2 = inlined_call_operand.vmem [shape: f32[1,2], index: 2, kind: input, shape index: {}]   ;;  %s584_s3 = inlined_call_operand.vmem [shape: f32[32,2], index: 3, kind: input, shape index: {}]   ;;  %s585_s4 = inlined_call_operand.vmem [shape: f32[32,1], index: 4, kind: input, shape index: {}]   ;;  %s586_s5 = inlined_call_operand.vmem [shape: f32[2,32,256], index: 5, kind: output, shape index: {}, may-alias: {0,5}]  }
   0x1   :  { %v369_v0 = vld [vmem:[%s581_s0 + $0x40] sm:$0xff]  ;;  %v374_v1 = vld [vmem:[%s581_s0 + $0x48] sm:$0xff]  ;;  %v391_v5 = vld [vmem:[%s581_s0 + $0x50] sm:$0xff] }
   0x2   :  { %v379_v2 = vld [vmem:[%s581_s0] sm:$0xff]  ;;  %v48_v3 = vadd.f32 %v374_v1, %v369_v0  ;;  %v386_v4 = vld [vmem:[%s581_s0 + $0x8] sm:$0xff]  ;;  %v396_v6 = vld [vmem:[%s581_s0 + $0x58] sm:$0xff] }
   0x3   :  { %v36_v7 = vadd.f32 %v386_v4, %v379_v2  ;;  %v403_v8 = vld [vmem:[%s581_s0 + $0x10] sm:$0xff]  ;;  %v408_v9 = vld [vmem:[%s581_s0 + $0x18] sm:$0xff]  ;;  %v51_v10 = vadd.f32 %v396_v6, %v391_v5  ;;  %v417_v12 = vld [vmem:[%s581_s0 + $0x60] sm:$0xff] }
   0x4   :  { %49 = vadd.xlane.f32.xlu1 %v48_v3  ;;  %v39_v11 = vadd.f32 %v408_v9, %v403_v8  ;;  %v422_v13 = vld [vmem:[%s581_s0 + $0x68] sm:$0xff]  ;;  %v427_v14 = vld [vmem:[%s581_s0 + $0x20] sm:$0xff]  ;;  %v441_v18 = vld [vmem:[%s581_s0 + $0x70] sm:$0xff] }
   0x5   :  { %37 = vadd.xlane.f32.xlu0 %v36_v7  ;;  %v432_v15 = vld [vmem:[%s581_s0 + $0x28] sm:$0xff]  ;;  %v54_v16 = vadd.f32 %v422_v13, %v417_v12  ;;  %v446_v19 = vld [vmem:[%s581_s0 + $0x78] sm:$0xff]  ;;  %v451_v20 = vld [vmem:[%s581_s0 + $0x30] sm:$0xff] }
   0x6   :  { %v42_v17 = vadd.f32 %v432_v15, %v427_v14  ;;  %v456_v21 = vld [vmem:[%s581_s0 + $0x38] sm:$0xff]  ;;  %v57_v22 = vadd.f32 %v446_v19, %v441_v18  ;;  %v68_v27 = vld [vmem:[%s582_s1] sm:$0xff]  ;;  %v69_v30 = vld [vmem:[%s582_s1 + $0x8] sm:$0xff] }
   0x7   :  { %v45_v23 = vadd.f32 %v456_v21, %v451_v20  ;;  %v70_v40 = vld [vmem:[%s582_s1 + $0x10] sm:$0xff]  ;;  %v71_v49 = vld [vmem:[%s582_s1 + $0x18] sm:$0xff] }
   0x8   :  { %52 = vadd.xlane.f32.xlu1 %v51_v10 }
   0x9   :  { %40 = vadd.xlane.f32.xlu0 %v39_v11 }
   0xc   :  { %55 = vadd.xlane.f32.xlu1 %v54_v16 }
   0xd   :  { %43 = vadd.xlane.f32.xlu0 %v42_v17 }
  0x10   :  { %58 = vadd.xlane.f32.xlu1 %v57_v22 }
  0x11   :  { %46 = vadd.xlane.f32.xlu0 %v45_v23 }
  0x91   :  { %v50_v24 = vpop.xlane.xlu1 %49 }
  0x92   :  { %v64_v25 = vmul.f32 0.00390625, %v50_v24  ;;  %v38_v26 = vpop.xlane.xlu0 %37  ;;  %v120_v24 = vlaneseq }
  0x93   :  { %v60_v33 = vmul.f32 0.00390625, %v38_v26 }
  0x94   :  { %v85_v28 = vmul.f32 %v68_v27, %v64_v25 }
  0x95   :  { %v53_v29 = vpop.xlane.xlu1 %52  ;;  %v81_v43 = vmul.f32 %v68_v27, %v60_v33 }
  0x96   :  { %v65_v31 = vmul.f32 0.00390625, %v53_v29  ;;  %v41_v32 = vpop.xlane.xlu0 %40  ;;  %v103_v35 = vsel %vm89_vm0, %v85_v28, 0.0  ;;  %v76_v29 = vld [vmem:[%s583_s2] sm:$0x1] }
  0x97   :  { %v61_v34 = vmul.f32 0.00390625, %v41_v32  ;;  %v90_v54 = vsel %vm89_vm0, %v81_v43, 0.0 }
  0x98   :  { %v86_v36 = vmul.f32 %v69_v30, %v65_v31 }
  0x99   :  { %v82_v37 = vmul.f32 %v69_v30, %v61_v34  ;;  %v56_v38 = vpop.xlane.xlu1 %55  ;;  %v121_v30 = vshrl.u32 %v120_v24, 7 }
  0x9a   :  { %v104_v39 = vsel %vm89_vm0, %v86_v36, 0.0  ;;  %v66_v41 = vmul.f32 0.00390625, %v56_v38  ;;  %v44_v42 = vpop.xlane.xlu0 %43  ;;  %v72_v38 = vld [vmem:[%s584_s3] sm:$0xff] }
  0x9b   :  { %v105_v44 = vadd.f32 %v104_v39, %v103_v35  ;;  %v62_v45 = vmul.f32 0.00390625, %v44_v42  ;;  %v91_v47 = vsel %vm89_vm0, %v82_v37, 0.0  ;;  %v122_v35 = vsub.s32 0, %v121_v30  ;;  %v73_v37 = vld [vmem:[%s584_s3 + $0x8] sm:$0xff]  ;;  %v74_v42 = vld [vmem:[%s584_s3 + $0x10] sm:$0xff] }
  0x9c   :  { %v87_v46 = vmul.f32 %v70_v40, %v66_v41  ;;  %v92_v58 = vadd.f32 %v91_v47, %v90_v54  ;;  %v75_v41 = vld [vmem:[%s584_s3 + $0x18] sm:$0xff] }
  0x9d   :  { %v83_v48 = vmul.f32 %v70_v40, %v62_v45  ;;  %v59_v50 = vpop.xlane.xlu1 %58 }
  0x9e   :  { %v106_v51 = vsel %vm89_vm0, %v87_v46, 0.0  ;;  %v67_v52 = vmul.f32 0.00390625, %v59_v50  ;;  %v47_v53 = vpop.xlane.xlu0 %46 }
  0x9f   :  { %v107_v55 = vadd.f32 %v106_v51, %v105_v44  ;;  %v93_v56 = vsel %vm89_vm0, %v83_v48, 0.0  ;;  %v63_v57 = vmul.f32 0.00390625, %v47_v53 }
  0xa0   :  { %v88_v59 = vmul.f32 %v71_v49, %v67_v52  ;;  %v94_v61 = vadd.f32 %v93_v56, %v92_v58 }
  0xa1   :  { %v84_v60 = vmul.f32 %v71_v49, %v63_v57 }
  0xa2   :  { %v108_v62 = vsel %vm89_vm0, %v88_v59, 0.0 }
  0xa3   :  { %v109_v63 = vadd.f32 %v108_v62, %v107_v55  ;;  %v95_v3 = vsel %vm89_vm0, %v84_v60, 0.0  ;;  %v335_v60 = vmov 0   ;;  %v77_v62 = vld [vmem:[%s585_s4] sm:$0xff] }
  0xa4   :  { %v96_v7 = vadd.f32 %v95_v3, %v94_v61  ;;  %302 = vset.pattern.permute.xlu1 %v335_v60  ;;  %301 = vset.pattern.permute.xlu0 %v335_v60  ;;  %v78_v61 = vld [vmem:[%s585_s4 + $0x8] sm:$0xff] }
  0xa5   :  { %v110_v10 = vrot.slane %v109_v63, 4 }
  0xa6   :  { %v97_v11 = vrot.slane %v96_v7, 4 }
  0xa7   :  { %v111_v16 = vadd.f32 %v110_v10, %v109_v63 }
  0xa8   :  { %v98_v17 = vadd.f32 %v97_v11, %v96_v7  ;;  %v80_v11 = vld [vmem:[%s585_s4 + $0x18] sm:$0xff] }
  0xa9   :  { %v112_v22 = vrot.slane %v111_v16, 2 }
  0xaa   :  { %v99_v23 = vrot.slane %v98_v17, 2 }
  0xab   :  { %v113_v25 = vadd.f32 %v112_v22, %v111_v16  ;;  %v79_v16 = vld [vmem:[%s585_s4 + $0x10] sm:$0xff] }
  0xac   :  { %v100_v26 = vadd.f32 %v99_v23, %v98_v17 }
  0xad   :  { %v114_v27 = vrot.slane %v113_v25, 1 }
  0xae   :  { %v101_v28 = vrot.slane %v100_v26, 1 }
  0xaf   :  { %v115_v31 = vadd.f32 %v114_v27, %v113_v25 }
  0xb0   :  { %v102_v32 = vadd.f32 %v101_v28, %v100_v26 }
  0xb1   :  { %v117_v33 = vadd.f32 %v115_v31, %v76_v29 }
  0xb2   :  { %v116_v34 = vadd.f32 %v102_v32, %v76_v29 }
  0xb3   :  { %v119_v39 = vmax.f32 %v117_v33, 0.0 }
  0xb4   :  { %v118_v36 = vmax.f32 %v116_v34, 0.0 }
  0xb5   :  { %v127_v45 = vrot.slane %v119_v39, %v122_v35 }
  0xb6   :  { %v123_v40 = vrot.slane %v118_v36, %v122_v35 }
  0xb7   :  { %v133_v52 = vmul.f32 %v127_v45, %v73_v37  ;;  %v132_v53 = vmul.f32 %v127_v45, %v72_v38  ;;  %v135_v56 = vmul.f32 %v127_v45, %v75_v41  ;;  %v134_v57 = vmul.f32 %v127_v45, %v74_v42 }
  0xb8   :  { %v129_v43 = vmul.f32 %v123_v40, %v73_v37  ;;  %v128_v44 = vmul.f32 %v123_v40, %v72_v38  ;;  %v131_v48 = vmul.f32 %v123_v40, %v75_v41  ;;  %v130_v49 = vmul.f32 %v123_v40, %v74_v42 }
  0xb9   :  { %v151_v54 = vsel %vm89_vm0, %v133_v52, 0.0  ;;  %v148_v55 = vsel %vm89_vm0, %v132_v53, 0.0  ;;  %v157_v58 = vsel %vm89_vm0, %v135_v56, 0.0  ;;  %v154_v59 = vsel %vm89_vm0, %v134_v57, 0.0 }
  0xba   :  { %v139_v46 = vsel %vm89_vm0, %v129_v43, 0.0  ;;  %v136_v47 = vsel %vm89_vm0, %v128_v44, 0.0  ;;  %v145_v50 = vsel %vm89_vm0, %v131_v48, 0.0  ;;  %v142_v51 = vsel %vm89_vm0, %v130_v49, 0.0 }
  0xbb   :  { %140 = vadd.xlane.f32.xlu1 %v139_v46  ;;  %137 = vadd.xlane.f32.xlu0 %v136_v47 }
  0xbf   :  { %146 = vadd.xlane.f32.xlu1 %v145_v50  ;;  %143 = vadd.xlane.f32.xlu0 %v142_v51 }
  0xc3   :  { %152 = vadd.xlane.f32.xlu1 %v151_v54  ;;  %149 = vadd.xlane.f32.xlu0 %v148_v55 }
  0xc7   :  { %158 = vadd.xlane.f32.xlu1 %v157_v58  ;;  %155 = vadd.xlane.f32.xlu0 %v154_v59 }
 0x148   :  { %v141_v63 = vpop.xlane.xlu1 %140  ;;  %v138_v3 = vpop.xlane.xlu0 %137 }
 0x149   :  { %v161_v7 = vadd.f32 %v141_v63, %v78_v61  ;;  %v160_v10 = vadd.f32 %v138_v3, %v77_v62 }
 0x14b   :  { %v293_v17 = vmul.f32 -1.442695, %v161_v7  ;;  %v292_v22 = vmul.f32 -1.442695, %v160_v10 }
 0x14c   :  { %v147_v23 = vpop.xlane.xlu1 %146  ;;  %v144_v24 = vpop.xlane.xlu0 %143 }
 0x14d   :  { %303 = vpow2.f32 %v293_v17  ;;  %v163_v25 = vadd.f32 %v147_v23, %v80_v11  ;;  %v162_v26 = vadd.f32 %v144_v24, %v79_v16 }
 0x14e   :  { %305 = vpow2.f32 %v292_v22 }
 0x14f   :  { %v295_v27 = vmul.f32 -1.442695, %v163_v25  ;;  %v294_v28 = vmul.f32 -1.442695, %v162_v26 }
 0x150   :  { %v153_v29 = vpop.xlane.xlu1 %152  ;;  %v150_v30 = vpop.xlane.xlu0 %149 }
 0x151   :  { %307 = vpow2.f32 %v295_v27  ;;  %v165_v31 = vadd.f32 %v153_v29, %v78_v61  ;;  %v164_v32 = vadd.f32 %v150_v30, %v77_v62 }
 0x152   :  { %309 = vpow2.f32 %v294_v28 }
 0x153   :  { %v296_v33 = vmul.f32 -1.442695, %v164_v32  ;;  %v297_v35 = vmul.f32 -1.442695, %v165_v31 }
 0x154   :  { %v156_v34 = vpop.xlane.xlu0 %155  ;;  %v159_v38 = vpop.xlane.xlu1 %158 }
 0x155   :  { %311 = vpow2.f32 %v296_v33  ;;  %v166_v36 = vadd.f32 %v156_v34, %v79_v16  ;;  %v167_v42 = vadd.f32 %v159_v38, %v80_v11 }
 0x156   :  { %313 = vpow2.f32 %v297_v35 }
 0x157   :  { %v304_v37 = vpop.eup %303  ;;  %v298_v43 = vmul.f32 -1.442695, %v166_v36  ;;  %v299_v47 = vmul.f32 -1.442695, %v167_v42 }
 0x158   :  { %v306_v39 = vpop.eup %305  ;;  %v193_v40 = vadd.f32 1.0, %v304_v37 }
 0x159   :  { %v192_v41 = vadd.f32 1.0, %v306_v39 }
 0x15a   :  { %315 = vrcp.f32 %v193_v40 }
 0x15b   :  { %v308_v44 = vpop.eup %307  ;;  %317 = vrcp.f32 %v192_v41 }
 0x15c   :  { %v310_v45 = vpop.eup %309  ;;  %319 = vpow2.f32 %v298_v43  ;;  %v195_v48 = vadd.f32 1.0, %v308_v44 }
 0x15d   :  { %v194_v46 = vadd.f32 1.0, %v310_v45 }
 0x15f   :  { %321 = vrcp.f32 %v194_v46  ;;  %v312_v49 = vpop.eup %311 }
 0x160   :  { %323 = vpow2.f32 %v299_v47  ;;  %v314_v50 = vpop.eup %313  ;;  %v196_v51 = vadd.f32 1.0, %v312_v49 }
 0x161   :  { %325 = vrcp.f32 %v195_v48  ;;  %v197_v54 = vadd.f32 1.0, %v314_v50 }
 0x162   :  { %327 = vrcp.f32 %v196_v51 }
 0x163   :  { %329 = vrcp.f32 %v197_v54 }
 0x164   :  { %v316_v52 = vpop.eup %315 }
 0x165   :  { %v318_v53 = vpop.eup %317  ;;  %223 = vperm.xlu1 %302, %v316_v52  }
 0x166   :  { %218 = vperm.xlu0 %301, %v318_v53   ;;  %v320_v55 = vpop.eup %319 }
 0x167   :  { %v198_v57 = vadd.f32 1.0, %v320_v55 }
 0x169   :  { %v322_v56 = vpop.eup %321  ;;  %331 = vrcp.f32 %v198_v57 }
 0x16a   :  { %228 = vperm.xlu1 %302, %v322_v56   ;;  %v324_v58 = vpop.eup %323 }
 0x16b   :  { %v326_v59 = vpop.eup %325  ;;  %v199_v60 = vadd.f32 1.0, %v324_v58 }
 0x16c   :  { %v328_v61 = vpop.eup %327 }
 0x16d   :  { %333 = vrcp.f32 %v199_v60  ;;  %v330_v62 = vpop.eup %329 }
 0x16e   :  { %233 = vperm.xlu1 %302, %v326_v59  }
 0x172   :  { %238 = vperm.xlu1 %302, %v328_v61  }
 0x173   :  { %v332_v63 = vpop.eup %331 }
 0x176   :  { %243 = vperm.xlu1 %302, %v330_v62  }
 0x177   :  { %v334_v3 = vpop.eup %333 }
 0x17a   :  { %248 = vperm.xlu1 %302, %v332_v63  }
 0x17e   :  { %253 = vperm.xlu1 %302, %v334_v3  }
 0x1e4   :  { %v224_v7 = vpop.permute.xlu1 %223 }
 0x1e5   :  { %v258_v10 = vmul.f32 %v224_v7, %v403_v8  ;;  %v259_v11 = vmul.f32 %v224_v7, %v408_v9  ;;  %v219_v16 = vpop.permute.xlu0 %218 }
 0x1e6   :  { %v256_v17 = vmul.f32 %v219_v16, %v379_v2  ;;  %v257_v22 = vmul.f32 %v219_v16, %v386_v4 }
 0x1e7   :  { %274 = vst [vmem:[%s586_s5 + $0x10] sm:$0xff] %v258_v10  ;;  %275 = vst [vmem:[%s586_s5 + $0x18] sm:$0xff] %v259_v11 }
 0x1e8   :  { %272 = vst [vmem:[%s586_s5] sm:$0xff] %v256_v17  ;;  %273 = vst [vmem:[%s586_s5 + $0x8] sm:$0xff] %v257_v22 }
 0x1e9   :  { %v229_v8 = vpop.permute.xlu1 %228 }
 0x1ea   :  { %v260_v2 = vmul.f32 %v229_v8, %v427_v14  ;;  %v261_v4 = vmul.f32 %v229_v8, %v432_v15 }
 0x1ec   :  { %276 = vst [vmem:[%s586_s5 + $0x20] sm:$0xff] %v260_v2  ;;  %277 = vst [vmem:[%s586_s5 + $0x28] sm:$0xff] %v261_v4 }
 0x1ed   :  { %v234_v9 = vpop.permute.xlu1 %233 }
 0x1ee   :  { %v262_v23 = vmul.f32 %v234_v9, %v451_v20  ;;  %v263_v24 = vmul.f32 %v234_v9, %v456_v21 }
 0x1f0   :  { %278 = vst [vmem:[%s586_s5 + $0x30] sm:$0xff] %v262_v23  ;;  %279 = vst [vmem:[%s586_s5 + $0x38] sm:$0xff] %v263_v24 }
 0x1f1   :  { %v239_v14 = vpop.permute.xlu1 %238 }
 0x1f2   :  { %v264_v15 = vmul.f32 %v239_v14, %v369_v0  ;;  %v265_v25 = vmul.f32 %v239_v14, %v374_v1 }
 0x1f4   :  { %280 = vst [vmem:[%s586_s5 + $0x40] sm:$0xff] %v264_v15  ;;  %281 = vst [vmem:[%s586_s5 + $0x48] sm:$0xff] %v265_v25 }
 0x1f5   :  { %v244_v20 = vpop.permute.xlu1 %243 }
 0x1f6   :  { %v266_v21 = vmul.f32 %v244_v20, %v391_v5  ;;  %v267_v26 = vmul.f32 %v244_v20, %v396_v6 }
 0x1f8   :  { %282 = vst [vmem:[%s586_s5 + $0x50] sm:$0xff] %v266_v21  ;;  %283 = vst [vmem:[%s586_s5 + $0x58] sm:$0xff] %v267_v26 }
 0x1f9   :  { %v249_v0 = vpop.permute.xlu1 %248 }
 0x1fa   :  { %v268_v1 = vmul.f32 %v249_v0, %v417_v12  ;;  %v269_v27 = vmul.f32 %v249_v0, %v422_v13 }
 0x1fc   :  { %284 = vst [vmem:[%s586_s5 + $0x60] sm:$0xff] %v268_v1  ;;  %285 = vst [vmem:[%s586_s5 + $0x68] sm:$0xff] %v269_v27 }
 0x1fd   :  { %v254_v5 = vpop.permute.xlu1 %253 }
 0x1fe   :  { %v270_v6 = vmul.f32 %v254_v5, %v441_v18  ;;  %v271_v28 = vmul.f32 %v254_v5, %v446_v19 }
 0x200   :  { %286 = vst [vmem:[%s586_s5 + $0x70] sm:$0xff] %v270_v6  ;;  %287 = vst [vmem:[%s586_s5 + $0x78] sm:$0xff] %v271_v28 }

</bundles_post_ra>
